<compile_context>
chip_gen: v6e
topology: v6e:2x2x1
jax: 0.10.0
libtpu: 0.0.40
codegen_flags: <defaults>
</compile_context>

<pallas_src>
import functools
import math

import jax
import jax.numpy as jnp
from jax.experimental import pallas as pl
from jax.experimental.pallas import tpu as pltpu

LOG_SIG_MIN = -20.0
_HALF_LOG_2PI = 0.5 * math.log(2.0 * math.pi)


def _round_up(x, m):
    return ((x + m - 1) // m) * m


def _pad2d(a, rows, cols, fill=0.0):
    pr, pc = rows - a.shape[0], cols - a.shape[1]
    if pr == 0 and pc == 0:
        return a
    return jnp.pad(a, ((0, pr), (0, pc)), constant_values=fill)


def _policy_kernel(
    obs_ref, eps_ref,
    w1_ref, b1_ref, w2_ref, b2_ref, w3_ref, b3_ref,
    wmu_ref, bmu_ref, std_ref,
    skill_ref, mean_ref,
):
    f32, bf16 = jnp.float32, jnp.bfloat16

    # linear1..linear3 + ReLU  (bf16 operands, f32 accumulation, f32 epilogue)
    h = jnp.dot(obs_ref[...], w1_ref[...], preferred_element_type=f32) + b1_ref[...]
    h = jnp.maximum(h, 0.0).astype(bf16)
    h = jnp.dot(h, w2_ref[...], preferred_element_type=f32) + b2_ref[...]
    h = jnp.maximum(h, 0.0).astype(bf16)
    h = jnp.dot(h, w3_ref[...], preferred_element_type=f32) + b3_ref[...]
    h = jnp.maximum(h, 0.0).astype(bf16)

    # mean head
    mean = jnp.dot(h, wmu_ref[...], preferred_element_type=f32) + bmu_ref[...]  # [TB, Zp] f32

    # skill = Normal(mean, std).rsample() = mean + std * eps
    skill_ref[...] = mean + std_ref[...] * eps_ref[...]
    mean_ref[...] = mean


def prepare_params(params):
    """One-time padding / casting of Policy parameters for the Pallas kernel.

    Do this once (per parameter update), not per forward call: it removes all
    convert/pad HBM traffic from the rollout-step hot path.
    """
    obs_dim, hidden_dim = params["w1"].shape
    z_dim = params["w_mu"].shape[1]

    Dp = _round_up(obs_dim, 128)
    Hp = _round_up(hidden_dim, 128)
    Zp = _round_up(z_dim, 128)

    bf16, f32 = jnp.bfloat16, jnp.float32

    # std = exp(clamp(log_std, min=LOG_SIG_MIN)) — parameter-only math.
    std_vec = jnp.exp(jnp.maximum(params["log_std"].astype(f32), LOG_SIG_MIN))
    # Constant part of log_prob averaged over z: mean(-log std) - 0.5*log(2*pi).
    logp_const = jnp.mean(-jnp.log(std_vec)) - _HALF_LOG_2PI

    prepared = {
        "w1": _pad2d(params["w1"].astype(bf16), Dp, Hp),
        "b1": _pad2d(params["b1"].reshape(1, -1).astype(f32), 1, Hp),
        "w2": _pad2d(params["w2"].astype(bf16), Hp, Hp),
        "b2": _pad2d(params["b2"].reshape(1, -1).astype(f32), 1, Hp),
        "w3": _pad2d(params["w3"].astype(bf16), Hp, Hp),
        "b3": _pad2d(params["b3"].reshape(1, -1).astype(f32), 1, Hp),
        "w_mu": _pad2d(params["w_mu"].astype(bf16), Hp, Zp),
        "b_mu": _pad2d(params["b_mu"].reshape(1, -1).astype(f32), 1, Zp),
        "std_p": _pad2d(std_vec.reshape(1, -1), 1, Zp, fill=1.0),  # pad lanes = 1
        "std_vec": std_vec,
        "logp_const": logp_const,
        "dims": (obs_dim, hidden_dim, z_dim),
        "padded_dims": (Dp, Hp, Zp),
    }
    return prepared


def policy_forward(obs, eps, prepared):
    """Policy.forward as one Pallas kernel.

    Args:
      obs:      [B, obs_dim] float32
      eps:      [B, z_dim]   float32 standard-normal noise for rsample
      prepared: output of prepare_params (pre-padded bf16/f32 weights)
    Returns:
      (skill, log_prob, density, mean) with density == (mean, std_vector).
    """
    B = obs.shape[0]
    _, _, z_dim = prepared["dims"]
    Dp, Hp, Zp = prepared["padded_dims"]

    # Batch tiling: big tiles (per-grid-step overhead ~0.35 us dominates this
    # tiny MLP), multiples of 16 for bf16 sublane packing, and >=2 grid steps
    # when B allows so the "parallel" axis spans both TensorCores on v7x.
    TB_MAX = 512
    if B <= 16:
        TB = 16
    elif B <= 2 * TB_MAX:
        TB = _round_up((B + 1) // 2, 16)
    else:
        TB = TB_MAX
    Bp = _round_up(B, TB)

    bf16, f32 = jnp.bfloat16, jnp.float32
    obs_p = _pad2d(obs.astype(bf16), Bp, Dp)
    eps_f32 = eps.astype(f32)
    eps_p = _pad2d(eps_f32, Bp, Zp)

    def batch_spec(shape):
        return pl.BlockSpec(shape, lambda i: (i, 0))

    def const_spec(shape):
        return pl.BlockSpec(shape, lambda i: (0, 0))

    # Scoped-VMEM estimate (double-buffered weights + I/O tiles + activations);
    # only raise the limit when the conservative default (~32 MiB) won't do.
    weight_vmem = 2 * (2 * (Dp * Hp + 2 * Hp * Hp + Hp * Zp)   # bf16 weights
                       + 4 * 8 * (3 * Hp + 2 * Zp))            # f32 bias/std rows
    io_vmem = 2 * (TB * Dp * 2 + 3 * TB * Zp * 4)
    act_vmem = 6 * TB * Hp * 4
    vmem_need = weight_vmem + io_vmem + act_vmem + (4 << 20)
    cp_kwargs = dict(dimension_semantics=("parallel",))
    if vmem_need > (32 << 20):
        cp_kwargs["vmem_limit_bytes"] = int(min(vmem_need, 100 << 20))
    # TODO(synk): if hidden_dim grows so large that the padded weight stack no
    # longer fits VMEM (roughly >=4K on v7x's 64 MiB), tile the hidden dim with
    # an extra grid axis instead of keeping whole weights resident.

    skill_p, mean_p = pl.pallas_call(
        _policy_kernel,
        out_shape=(
            jax.ShapeDtypeStruct((Bp, Zp), f32),   # skill
            jax.ShapeDtypeStruct((Bp, Zp), f32),   # mean
        ),
        grid=(Bp // TB,),
        in_specs=[
            batch_spec((TB, Dp)),                        # obs
            batch_spec((TB, Zp)),                        # eps
            const_spec((Dp, Hp)), const_spec((1, Hp)),   # linear1
            const_spec((Hp, Hp)), const_spec((1, Hp)),   # linear2
            const_spec((Hp, Hp)), const_spec((1, Hp)),   # linear3
            const_spec((Hp, Zp)), const_spec((1, Zp)),   # mean_linear
            const_spec((1, Zp)),                         # std vector
        ],
        out_specs=[
            batch_spec((TB, Zp)),
            batch_spec((TB, Zp)),
        ],
        compiler_params=pltpu.CompilerParams(**cp_kwargs),
    )(obs_p, eps_p,
      prepared["w1"], prepared["b1"], prepared["w2"], prepared["b2"],
      prepared["w3"], prepared["b3"], prepared["w_mu"], prepared["b_mu"],
      prepared["std_p"])

    skill = skill_p[:B, :z_dim]
    mean = mean_p[:B, :z_dim]

    # log_prob = mean_z(-0.5*eps^2 - log(std) - 0.5*log(2*pi));
    # (skill - mean)/std == eps exactly, so compute straight from eps.
    log_prob = -0.5 * jnp.mean(eps_f32 * eps_f32, axis=1, keepdims=True) + prepared["logp_const"]

    # TODO(synk): torch.distributions.Normal has no Pallas/JAX kernel
    # equivalent; the distribution is returned as its parameters (mean, std).
    density = (mean, prepared["std_vec"])
    return skill, log_prob, density, mean


def init_params(key, obs_dim, z_dim, hidden_dim):
    """nn.Linear-style init (uniform +/- 1/sqrt(fan_in)); W stored [in, out]."""
    keys = jax.random.split(key, 8)

    def linear(kw, kb, fan_in, fan_out):
        bound = 1.0 / math.sqrt(fan_in)
        w = jax.random.uniform(kw, (fan_in, fan_out), jnp.float32, -bound, bound)
        b = jax.random.uniform(kb, (fan_out,), jnp.float32, -bound, bound)
        return w, b

    w1, b1 = linear(keys[0], keys[1], obs_dim, hidden_dim)
    w2, b2 = linear(keys[2], keys[3], hidden_dim, hidden_dim)
    w3, b3 = linear(keys[4], keys[5], hidden_dim, hidden_dim)
    w_mu, b_mu = linear(keys[6], keys[7], hidden_dim, z_dim)
    log_std = jnp.zeros((z_dim,), jnp.float32)   # log_std.data.fill_(log(1))
    return {"w1": w1, "b1": b1, "w2": w2, "b2": b2, "w3": w3, "b3": b3,
            "w_mu": w_mu, "b_mu": b_mu, "log_std": log_std}


def reference_forward(obs, eps, params):
    """Pure-JAX reference with the same numerics (bf16 weights, f32 accum)."""
    bf16, f32 = jnp.bfloat16, jnp.float32

    def layer(h, w, b):
        y = jnp.dot(h, w.astype(bf16), preferred_element_type=f32) + b.reshape(1, -1)
        return jnp.maximum(y, 0.0).astype(bf16)

    h = layer(obs.astype(bf16), params["w1"], params["b1"])
    h = layer(h, params["w2"], params["b2"])
    h = layer(h, params["w3"], params["b3"])
    mean = (jnp.dot(h, params["w_mu"].astype(bf16), preferred_element_type=f32)
            + params["b_mu"].reshape(1, -1))
    std = jnp.exp(jnp.maximum(params["log_std"], LOG_SIG_MIN))
    skill = mean + std * eps
    logp = -0.5 * ((skill - mean) / std) ** 2 - jnp.log(std) - _HALF_LOG_2PI
    log_prob = jnp.mean(logp, axis=1, keepdims=True)
    return skill, log_prob, mean, std


if __name__ == "__main__":
    # Small shapes consistent with Policy.forward
    batch = 8
    obs_dim = 16
    z_dim = 8
    hidden_dim = 32

    key = jax.random.PRNGKey(0)
    k_param, k_obs, k_eps = jax.random.split(key, 3)

    params = init_params(k_param, obs_dim, z_dim, hidden_dim)
    obs = jax.random.normal(k_obs, (batch, obs_dim), jnp.float32)
    eps = jax.random.normal(k_eps, (batch, z_dim), jnp.float32)

    prepared = prepare_params(params)   # one-time padded/cast weights
    skill, log_prob, density, mean = policy_forward(obs, eps, prepared)
    jax.block_until_ready((skill, log_prob, mean))

    ref_skill, ref_logp, ref_mean, ref_std = reference_forward(obs, eps, params)
    assert jnp.allclose(skill, ref_skill, atol=1e-4, rtol=1e-4)
    assert jnp.allclose(log_prob, ref_logp, atol=1e-4, rtol=1e-4)
    assert jnp.allclose(mean, ref_mean, atol=1e-4, rtol=1e-4)
    assert jnp.allclose(density[1], ref_std, atol=1e-6, rtol=1e-6)

    print("KERNEL_OK")
</pallas_src>

<mosaic_0001>
module attributes {stable_mosaic.version = 11 : i64} {
  func.func @_policy_kernel(%arg0: i32, %arg1: memref<16x128xbf16, #tpu.memory_space<vmem>>, %arg2: memref<16x128xf32, #tpu.memory_space<vmem>>, %arg3: memref<128x128xbf16, #tpu.memory_space<vmem>>, %arg4: memref<1x128xf32, #tpu.memory_space<vmem>>, %arg5: memref<128x128xbf16, #tpu.memory_space<vmem>>, %arg6: memref<1x128xf32, #tpu.memory_space<vmem>>, %arg7: memref<128x128xbf16, #tpu.memory_space<vmem>>, %arg8: memref<1x128xf32, #tpu.memory_space<vmem>>, %arg9: memref<128x128xbf16, #tpu.memory_space<vmem>>, %arg10: memref<1x128xf32, #tpu.memory_space<vmem>>, %arg11: memref<1x128xf32, #tpu.memory_space<vmem>>, %arg12: memref<16x128xf32, #tpu.memory_space<vmem>>, %arg13: memref<16x128xf32, #tpu.memory_space<vmem>>) attributes {dimension_semantics = [#tpu.dimension_semantics<parallel>], iteration_bounds = array<i64: 1>, scalar_prefetch = 0 : i64, scratch_operands = 0 : i64, tpu.core_type = #tpu.core_type<tc>, window_params = [{transform_indices = @transform_0, window_bounds = array<i64: 16, 128>}, {transform_indices = @transform_1, window_bounds = array<i64: 16, 128>}, {pipeline_mode = #tpu.pipeline_mode<synchronous>, transform_indices = @transform_2, window_bounds = array<i64: 128, 128>}, {pipeline_mode = #tpu.pipeline_mode<synchronous>, transform_indices = @transform_3, window_bounds = array<i64: 1, 128>}, {pipeline_mode = #tpu.pipeline_mode<synchronous>, transform_indices = @transform_4, window_bounds = array<i64: 128, 128>}, {pipeline_mode = #tpu.pipeline_mode<synchronous>, transform_indices = @transform_5, window_bounds = array<i64: 1, 128>}, {pipeline_mode = #tpu.pipeline_mode<synchronous>, transform_indices = @transform_6, window_bounds = array<i64: 128, 128>}, {pipeline_mode = #tpu.pipeline_mode<synchronous>, transform_indices = @transform_7, window_bounds = array<i64: 1, 128>}, {pipeline_mode = #tpu.pipeline_mode<synchronous>, transform_indices = @transform_8, window_bounds = array<i64: 128, 128>}, {pipeline_mode = #tpu.pipeline_mode<synchronous>, transform_indices = @transform_9, window_bounds = array<i64: 1, 128>}, {pipeline_mode = #tpu.pipeline_mode<synchronous>, transform_indices = @transform_10, window_bounds = array<i64: 1, 128>}, {transform_indices = @transform_11, window_bounds = array<i64: 16, 128>}, {transform_indices = @transform_12, window_bounds = array<i64: 16, 128>}]} {
    %c0 = arith.constant 0 : index
    %c0_0 = arith.constant 0 : index
    %0 = vector.load %arg1[%c0, %c0_0] : memref<16x128xbf16, #tpu.memory_space<vmem>>, vector<16x128xbf16>
    %c0_1 = arith.constant 0 : index
    %c0_2 = arith.constant 0 : index
    %1 = vector.load %arg3[%c0_1, %c0_2] : memref<128x128xbf16, #tpu.memory_space<vmem>>, vector<128x128xbf16>
    %cst = arith.constant dense<0.000000e+00> : vector<16x128xf32>
    %2 = tpu.matmul %0, %1, %cst {dimension_numbers = #tpu.dot_dimension_numbers<[1], [0], [0], [1], [0, 0, 1, 1], [], []>} : vector<16x128xbf16>, vector<128x128xbf16>, vector<16x128xf32> -> vector<16x128xf32>
    %c0_3 = arith.constant 0 : index
    %c0_4 = arith.constant 0 : index
    %3 = vector.load %arg4[%c0_3, %c0_4] : memref<1x128xf32, #tpu.memory_space<vmem>>, vector<1x128xf32>
    %4 = vector.broadcast %3 : vector<1x128xf32> to vector<16x128xf32>
    %5 = arith.addf %2, %4 : vector<16x128xf32>
    %cst_5 = arith.constant 0.000000e+00 : f32
    %6 = vector.broadcast %cst_5 : f32 to vector<16x128xf32>
    %7 = arith.maximumf %5, %6 : vector<16x128xf32>
    %8 = arith.truncf %7 : vector<16x128xf32> to vector<16x128xbf16>
    %c0_6 = arith.constant 0 : index
    %c0_7 = arith.constant 0 : index
    %9 = vector.load %arg5[%c0_6, %c0_7] : memref<128x128xbf16, #tpu.memory_space<vmem>>, vector<128x128xbf16>
    %cst_8 = arith.constant dense<0.000000e+00> : vector<16x128xf32>
    %10 = tpu.matmul %8, %9, %cst_8 {dimension_numbers = #tpu.dot_dimension_numbers<[1], [0], [0], [1], [0, 0, 1, 1], [], []>} : vector<16x128xbf16>, vector<128x128xbf16>, vector<16x128xf32> -> vector<16x128xf32>
    %c0_9 = arith.constant 0 : index
    %c0_10 = arith.constant 0 : index
    %11 = vector.load %arg6[%c0_9, %c0_10] : memref<1x128xf32, #tpu.memory_space<vmem>>, vector<1x128xf32>
    %12 = vector.broadcast %11 : vector<1x128xf32> to vector<16x128xf32>
    %13 = arith.addf %10, %12 : vector<16x128xf32>
    %cst_11 = arith.constant 0.000000e+00 : f32
    %14 = vector.broadcast %cst_11 : f32 to vector<16x128xf32>
    %15 = arith.maximumf %13, %14 : vector<16x128xf32>
    %16 = arith.truncf %15 : vector<16x128xf32> to vector<16x128xbf16>
    %c0_12 = arith.constant 0 : index
    %c0_13 = arith.constant 0 : index
    %17 = vector.load %arg7[%c0_12, %c0_13] : memref<128x128xbf16, #tpu.memory_space<vmem>>, vector<128x128xbf16>
    %cst_14 = arith.constant dense<0.000000e+00> : vector<16x128xf32>
    %18 = tpu.matmul %16, %17, %cst_14 {dimension_numbers = #tpu.dot_dimension_numbers<[1], [0], [0], [1], [0, 0, 1, 1], [], []>} : vector<16x128xbf16>, vector<128x128xbf16>, vector<16x128xf32> -> vector<16x128xf32>
    %c0_15 = arith.constant 0 : index
    %c0_16 = arith.constant 0 : index
    %19 = vector.load %arg8[%c0_15, %c0_16] : memref<1x128xf32, #tpu.memory_space<vmem>>, vector<1x128xf32>
    %20 = vector.broadcast %19 : vector<1x128xf32> to vector<16x128xf32>
    %21 = arith.addf %18, %20 : vector<16x128xf32>
    %cst_17 = arith.constant 0.000000e+00 : f32
    %22 = vector.broadcast %cst_17 : f32 to vector<16x128xf32>
    %23 = arith.maximumf %21, %22 : vector<16x128xf32>
    %24 = arith.truncf %23 : vector<16x128xf32> to vector<16x128xbf16>
    %c0_18 = arith.constant 0 : index
    %c0_19 = arith.constant 0 : index
    %25 = vector.load %arg9[%c0_18, %c0_19] : memref<128x128xbf16, #tpu.memory_space<vmem>>, vector<128x128xbf16>
    %cst_20 = arith.constant dense<0.000000e+00> : vector<16x128xf32>
    %26 = tpu.matmul %24, %25, %cst_20 {dimension_numbers = #tpu.dot_dimension_numbers<[1], [0], [0], [1], [0, 0, 1, 1], [], []>} : vector<16x128xbf16>, vector<128x128xbf16>, vector<16x128xf32> -> vector<16x128xf32>
    %c0_21 = arith.constant 0 : index
    %c0_22 = arith.constant 0 : index
    %27 = vector.load %arg10[%c0_21, %c0_22] : memref<1x128xf32, #tpu.memory_space<vmem>>, vector<1x128xf32>
    %28 = vector.broadcast %27 : vector<1x128xf32> to vector<16x128xf32>
    %29 = arith.addf %26, %28 : vector<16x128xf32>
    %c0_23 = arith.constant 0 : index
    %c0_24 = arith.constant 0 : index
    %30 = vector.load %arg11[%c0_23, %c0_24] : memref<1x128xf32, #tpu.memory_space<vmem>>, vector<1x128xf32>
    %c0_25 = arith.constant 0 : index
    %c0_26 = arith.constant 0 : index
    %31 = vector.load %arg2[%c0_25, %c0_26] : memref<16x128xf32, #tpu.memory_space<vmem>>, vector<16x128xf32>
    %32 = vector.broadcast %30 : vector<1x128xf32> to vector<16x128xf32>
    %33 = arith.mulf %32, %31 : vector<16x128xf32>
    %34 = arith.addf %29, %33 : vector<16x128xf32>
    %c0_27 = arith.constant 0 : index
    %c0_28 = arith.constant 0 : index
    %35 = vector.load %arg12[%c0_27, %c0_28] : memref<16x128xf32, #tpu.memory_space<vmem>>, vector<16x128xf32>
    tpu.vector_store %arg12[%c0_27, %c0_28], %34 {strides = array<i32>} : memref<16x128xf32, #tpu.memory_space<vmem>>, vector<16x128xf32>,
    %c0_29 = arith.constant 0 : index
    %c0_30 = arith.constant 0 : index
    %36 = vector.load %arg13[%c0_29, %c0_30] : memref<16x128xf32, #tpu.memory_space<vmem>>, vector<16x128xf32>
    tpu.vector_store %arg13[%c0_29, %c0_30], %29 {strides = array<i32>} : memref<16x128xf32, #tpu.memory_space<vmem>>, vector<16x128xf32>,
    return
  }
  func.func @transform_0(%arg0: i32) -> (i32, i32) {
    %c0_i32 = arith.constant 0 : i32
    %c0_i32_0 = arith.constant 0 : i32
    return %arg0, %c0_i32 : i32, i32
  }
  func.func @transform_1(%arg0: i32) -> (i32, i32) {
    %c0_i32 = arith.constant 0 : i32
    %c0_i32_0 = arith.constant 0 : i32
    return %arg0, %c0_i32 : i32, i32
  }
  func.func @transform_2(%arg0: i32) -> (i32, i32) {
    %c0_i32 = arith.constant 0 : i32
    %c0_i32_0 = arith.constant 0 : i32
    %c0_i32_1 = arith.constant 0 : i32
    return %c0_i32, %c0_i32_0 : i32, i32
  }
  func.func @transform_3(%arg0: i32) -> (i32, i32) {
    %c0_i32 = arith.constant 0 : i32
    %c0_i32_0 = arith.constant 0 : i32
    %c0_i32_1 = arith.constant 0 : i32
    return %c0_i32, %c0_i32_0 : i32, i32
  }
  func.func @transform_4(%arg0: i32) -> (i32, i32) {
    %c0_i32 = arith.constant 0 : i32
    %c0_i32_0 = arith.constant 0 : i32
    %c0_i32_1 = arith.constant 0 : i32
    return %c0_i32, %c0_i32_0 : i32, i32
  }
  func.func @transform_5(%arg0: i32) -> (i32, i32) {
    %c0_i32 = arith.constant 0 : i32
    %c0_i32_0 = arith.constant 0 : i32
    %c0_i32_1 = arith.constant 0 : i32
    return %c0_i32, %c0_i32_0 : i32, i32
  }
  func.func @transform_6(%arg0: i32) -> (i32, i32) {
    %c0_i32 = arith.constant 0 : i32
    %c0_i32_0 = arith.constant 0 : i32
    %c0_i32_1 = arith.constant 0 : i32
    return %c0_i32, %c0_i32_0 : i32, i32
  }
  func.func @transform_7(%arg0: i32) -> (i32, i32) {
    %c0_i32 = arith.constant 0 : i32
    %c0_i32_0 = arith.constant 0 : i32
    %c0_i32_1 = arith.constant 0 : i32
    return %c0_i32, %c0_i32_0 : i32, i32
  }
  func.func @transform_8(%arg0: i32) -> (i32, i32) {
    %c0_i32 = arith.constant 0 : i32
    %c0_i32_0 = arith.constant 0 : i32
    %c0_i32_1 = arith.constant 0 : i32
    return %c0_i32, %c0_i32_0 : i32, i32
  }
  func.func @transform_9(%arg0: i32) -> (i32, i32) {
    %c0_i32 = arith.constant 0 : i32
    %c0_i32_0 = arith.constant 0 : i32
    %c0_i32_1 = arith.constant 0 : i32
    return %c0_i32, %c0_i32_0 : i32, i32
  }
  func.func @transform_10(%arg0: i32) -> (i32, i32) {
    %c0_i32 = arith.constant 0 : i32
    %c0_i32_0 = arith.constant 0 : i32
    %c0_i32_1 = arith.constant 0 : i32
    return %c0_i32, %c0_i32_0 : i32, i32
  }
  func.func @transform_11(%arg0: i32) -> (i32, i32) {
    %c0_i32 = arith.constant 0 : i32
    %c0_i32_0 = arith.constant 0 : i32
    return %arg0, %c0_i32 : i32, i32
  }
  func.func @transform_12(%arg0: i32) -> (i32, i32) {
    %c0_i32 = arith.constant 0 : i32
    %c0_i32_0 = arith.constant 0 : i32
    return %arg0, %c0_i32 : i32, i32
  }
}

</mosaic_0001>

<bundles_post_ra>
// kernel: tpu_custom_call.1
= control target key start
LH: loop header
LB: loop body
LE: loop exit
PB: predicated region body
PF: predicated region fallthrough
CT: control target
= control target key end

     0   :  { %18 = vsyncpa [#allocation3], 0  ;;  %s1198_s0 = inlined_call_operand.hbm [shape: bf16[16,128], index: 0, kind: input, shape index: {}]   ;;  %s1199_s1 = inlined_call_operand.hbm [shape: f32[16,128], index: 1, kind: input, shape index: {}]   ;;  %s1200_s2 = inlined_call_operand.hbm [shape: bf16[128,128], index: 2, kind: input, shape index: {}]   ;;  %s1201_s3 = inlined_call_operand.vmem [shape: f32[1,128], index: 3, kind: input, shape index: {}]   ;;  %s1202_s4 = inlined_call_operand.hbm [shape: bf16[128,128], index: 4, kind: input, shape index: {}]   ;;  %s1203_s5 = inlined_call_operand.vmem [shape: f32[1,128], index: 5, kind: input, shape index: {}]   ;;  %s1204_s6 = inlined_call_operand.hbm [shape: bf16[128,128], index: 6, kind: input, shape index: {}]   ;;  %s1205_s7 = inlined_call_operand.vmem [shape: f32[1,128], index: 7, kind: input, shape index: {}]   ;;  %s1206_s8 = inlined_call_operand.hbm [shape: bf16[128,128], index: 8, kind: input, shape index: {}]   ;;  %s1207_s9 = inlined_call_operand.vmem [shape: f32[1,128], index: 9, kind: input, shape index: {}]   ;;  %s1208_s10 = inlined_call_operand.vmem [shape: f32[1,128], index: 10, kind: input, shape index: {}]   ;;  %s1209_s11 = inlined_call_operand.hbm [shape: f32[16,128], index: 11, kind: output, shape index: {0}]   ;;  %s1210_s12 = inlined_call_operand.hbm [shape: f32[16,128], index: 12, kind: output, shape index: {1}]  }
   0x1   :  { %19 = vsyncpa [#allocation6], 0 }
   0x2   :  { %20 = vsyncpa [#allocation9], 0 }
   0x3   :  { %21 = vsyncpa [#allocation12], 0 }
   0x4   :  { %22 = vsyncpa [#allocation4], 0 }
   0x5   :  { %23 = vsyncpa [#allocation15], 0  ;;  %s1016_s21 = smov [#allocation5]  }
   0x6   :  { %s41_s22 = sshll.u32 %s1016_s21, 4  ;;  %s42_s22 = int_to_ptr.vmem [resolvable:$true] %s41_s22 }
   0x7   :  { %s852_s23 = scalar_lea.vmem %s42_s22, 256  ;;  %p857_p1 = scmp.lt.s32.totalorder %s42_s22, %s42_s22 }
   0x8   :  { %p853_p0 = scmp.ne.s32.totalorder %s42_s22, %s852_s23  ;;  %p858_p2 = scmp.lt.s32.totalorder %s852_s23, %s852_s23 }
   0xa   :  { %p859_p3 = por %p858_p2, %p857_p1 }
   0xc   :  { %p860_p4 = pnand %p859_p3, %p853_p0 }
   0xe   :  { %863 = shalt.err (!%p860_p4)
}
   0xf   :  { %s1017_s24 = smov 128   ;;  %s1018_s25 = smov 8  }
  0x10   :  { %47 = dma.hbm_to_vmem [thread:$0]  %s1199_s1, 256, %s42_s22, [#allocation6], %s1017_s24, %s1017_s24, %s1018_s25  }
  0x11   :  { %s1019_s28 = smov [#allocation8]   ;;  %s1020_s30 = smov [#allocation2]  }
  0x12   :  { %s67_s29 = sshll.u32 %s1019_s28, 4  ;;  %s29_s13 = sshll.u32 %s1020_s30, 4  ;;  %s68_s29 = int_to_ptr.vmem [resolvable:$true] %s67_s29  ;;  %s30_s13 = int_to_ptr.vmem [resolvable:$true] %s29_s13 }
  0x13   :  { %s872_s14 = scalar_lea.vmem %s68_s29, 1024  ;;  %p877_p6 = scmp.lt.s32.totalorder %s68_s29, %s68_s29 }
  0x14   :  { %p873_p5 = scmp.ne.s32.totalorder %s68_s29, %s872_s14  ;;  %p878_p7 = scmp.lt.s32.totalorder %s872_s14, %s872_s14 }
  0x16   :  { %p879_p8 = por %p878_p7, %p877_p6 }
  0x18   :  { %p880_p9 = pnand %p879_p8, %p873_p5 }
  0x1a   :  { %883 = shalt.err (!%p880_p9)
}
  0x1b   :  { %s1021_s15 = smov 64   ;;  %s1022_s16 = smov 4  }
  0x1c   :  { %73 = dma.hbm_to_vmem [thread:$0]  %s1202_s4, 1024, %s68_s29, [#allocation9], %s1021_s15, %s1021_s15, %s1022_s16  }
  0x1d   :  { %s892_s1 = scalar_lea.vmem %s30_s13, 128  ;;  %p897_p11 = scmp.lt.s32.totalorder %s30_s13, %s30_s13 }
  0x1e   :  { %p893_p10 = scmp.ne.s32.totalorder %s30_s13, %s892_s1  ;;  %p898_p12 = scmp.lt.s32.totalorder %s892_s1, %s892_s1 }
  0x20   :  { %p899_p13 = por %p898_p12, %p897_p11 }
  0x22   :  { %p900_p0 = pnand %p899_p13, %p893_p10 }
  0x24   :  { %903 = shalt.err (!%p900_p0)
}
  0x25   :  { %35 = dma.hbm_to_vmem [thread:$0]  %s1198_s0, 128, %s30_s13, [#allocation3], %s1021_s15, %s1021_s15, %s1022_s16  }
  0x26   :  { %s1023_s21 = smov [#allocation7]   ;;  %s1024_s23 = smov [#allocation10]  }
  0x27   :  { %s53_s22 = sshll.u32 %s1023_s21, 4  ;;  %s81_s4 = sshll.u32 %s1024_s23, 4  ;;  %s54_s22 = int_to_ptr.vmem [resolvable:$true] %s53_s22  ;;  %s82_s4 = int_to_ptr.vmem [resolvable:$true] %s81_s4 }
  0x28   :  { %s912_s26 = scalar_lea.vmem %s54_s22, 1024  ;;  %p917_p2 = scmp.lt.s32.totalorder %s54_s22, %s54_s22 }
  0x29   :  { %p913_p1 = scmp.ne.s32.totalorder %s54_s22, %s912_s26  ;;  %p918_p3 = scmp.lt.s32.totalorder %s912_s26, %s912_s26 }
  0x2b   :  { %p919_p4 = por %p918_p3, %p917_p2 }
  0x2d   :  { %p920_p5 = pnand %p919_p4, %p913_p1 }
  0x2f   :  { %923 = shalt.err (!%p920_p5)
}
  0x30   :  { %59 = dma.hbm_to_vmem [thread:$0]  %s1200_s2, 1024, %s54_s22, [#allocation6], %s1021_s15, %s1021_s15, %s1022_s16  }
  0x31   :  { %s932_s0 = scalar_lea.vmem %s82_s4, 1024  ;;  %p937_p7 = scmp.lt.s32.totalorder %s82_s4, %s82_s4 }
  0x32   :  { %p933_p6 = scmp.ne.s32.totalorder %s82_s4, %s932_s0  ;;  %p938_p8 = scmp.lt.s32.totalorder %s932_s0, %s932_s0 }
  0x34   :  { %p939_p9 = por %p938_p8, %p937_p7 }
  0x36   :  { %p940_p10 = pnand %p939_p9, %p933_p6 }
  0x38   :  { %943 = shalt.err (!%p940_p10)
}
  0x39   :  { %87 = dma.hbm_to_vmem [thread:$0]  %s1204_s6, 1024, %s82_s4, [#allocation9], %s1021_s15, %s1021_s15, %s1022_s16  }
  0x3a   :  { %s1025_s13 = smov [#allocation11]  }
  0x3b   :  { %s95_s14 = sshll.u32 %s1025_s13, 4  ;;  %s96_s14 = int_to_ptr.vmem [resolvable:$true] %s95_s14 }
  0x3c   :  { %s952_s17 = scalar_lea.vmem %s96_s14, 1024  ;;  %p957_p12 = scmp.lt.s32.totalorder %s96_s14, %s96_s14 }
  0x3d   :  { %p953_p11 = scmp.ne.s32.totalorder %s96_s14, %s952_s17  ;;  %p958_p13 = scmp.lt.s32.totalorder %s952_s17, %s952_s17 }
  0x3f   :  { %p959_p0 = por %p958_p13, %p957_p12 }
  0x41   :  { %p960_p1 = pnand %p959_p0, %p953_p11 }
  0x43   :  { %963 = shalt.err (!%p960_p1)
}
  0x44   :  { %101 = dma.hbm_to_vmem [thread:$0]  %s1206_s8, 1024, %s96_s14, [#allocation12], %s1021_s15, %s1021_s15, %s1022_s16  }
  0x45   :  { %1004 = dma.done.wait [#allocation3], 128  }
  0x46   :  { %1005 = vsyncadd [#allocation3], 4294967168 }
  0x47   :  { %1006 = dma.done.wait [#allocation6], 1280  }
  0x48   :  { %1007 = vsyncadd [#allocation6], 4294966016 }
  0x49   :  { %1008 = dma.done.wait [#allocation9], 2048  }
  0x4a   :  { %1009 = vsyncadd [#allocation9], 4294965248 }
  0x4b   :  { %1010 = dma.done.wait [#allocation12], 1024  }
  0x4c   :  { %1011 = vsyncadd [#allocation12], 4294966272  ;;  %v1026_v0 = vmov 0.0   ;;  %vm1027_vm0 = vmmov 0   ;;  %v811_v1 = vld [vmem:[#allocation7 + $0x38] sm:$0xff]   ;;  %v812_v2 = vld [vmem:[#allocation7 + $0x30] sm:$0xff]  }
  0x4d   :  { %717 = vmatprep.subr.bf16.mxu0 %v1026_v0  ;;  %733 = vmatprep.mubr.msk.bf16.mxu0 %vm1027_vm0, %v1026_v0  ;;  %v813_v3 = vld [vmem:[#allocation7 + $0x28] sm:$0xff]   ;;  %v820_v4 = vld [vmem:[#allocation8 + $0x38] sm:$0xff]   ;;  %v814_v5 = vld [vmem:[#allocation7 + $0x20] sm:$0xff]   ;;  %s1029_s23 = smov [#allocation13]  }
  0x4e   :  { %737 = vmatprep.subr.bf16.mxu1 %v1026_v0  ;;  %753 = vmatprep.mubr.msk.bf16.mxu1 %vm1027_vm0, %v1026_v0  ;;  %v821_v6 = vld [vmem:[#allocation8 + $0x30] sm:$0xff]   ;;  %v815_v7 = vld [vmem:[#allocation7 + $0x18] sm:$0xff]   ;;  %v822_v8 = vld [vmem:[#allocation8 + $0x28] sm:$0xff]   ;;  %s612_s4 = sshll.u32 %s1029_s23, 4  ;;  %s613_s4 = int_to_ptr.vmem [resolvable:$true] %s612_s4 }
  0x4f   :  { %718 = vmatpush3.bf16.msra.mxu0 %v811_v1  ;;  %738 = vmatpush3.bf16.msra.mxu1 %v820_v4  ;;  %v816_v9 = vld [vmem:[#allocation7 + $0x10] sm:$0xff]   ;;  %v823_v10 = vld [vmem:[#allocation8 + $0x20] sm:$0xff]   ;;  %v817_v11 = vld [vmem:[#allocation7 + $0x8] sm:$0xff]  }
  0x50   :  { %719 = vmatprep.subr.bf16.mxu0 %v1026_v0  ;;  %739 = vmatprep.subr.bf16.mxu1 %v1026_v0  ;;  %v824_v12 = vld [vmem:[#allocation8 + $0x18] sm:$0xff]   ;;  %v818_v13 = vld [vmem:[#allocation7] sm:$0xff]   ;;  %v819_v14 = vld [vmem:[#allocation2] sm:$0xff]  }
  0x51   :  { %v825_v15 = vld [vmem:[#allocation8 + $0x10] sm:$0xff]   ;;  %v826_v16 = vld [vmem:[#allocation8 + $0x8] sm:$0xff]   ;;  %v827_v17 = vld [vmem:[#allocation8] sm:$0xff]  }
  0x52   :  { %v828_v18 = vld [vmem:[#allocation10 + $0x38] sm:$0xff]   ;;  %v829_v19 = vld [vmem:[#allocation10 + $0x30] sm:$0xff]   ;;  %v830_v20 = vld [vmem:[#allocation10 + $0x28] sm:$0xff]  }
  0x53   :  { %720 = vmatpush3.bf16.msra.mxu0 %v812_v2  ;;  %740 = vmatpush3.bf16.msra.mxu1 %v821_v6  ;;  %v831_v21 = vld [vmem:[#allocation10 + $0x20] sm:$0xff]   ;;  %v832_v22 = vld [vmem:[#allocation10 + $0x18] sm:$0xff]   ;;  %v643_v23 = vld [vmem:[%s1201_s3] ss:$0 sm:$0xff] }
  0x54   :  { %721 = vmatprep.subr.bf16.mxu0 %v1026_v0  ;;  %741 = vmatprep.subr.bf16.mxu1 %v1026_v0  ;;  %v833_v33 = vld [vmem:[#allocation10 + $0x10] sm:$0xff]   ;;  %v834_v34 = vld [vmem:[#allocation10 + $0x8] sm:$0xff]   ;;  %v835_v35 = vld [vmem:[#allocation10] sm:$0xff]  }
  0x55   :  { %v836_v36 = vld [vmem:[#allocation11 + $0x38] sm:$0xff]   ;;  %v837_v37 = vld [vmem:[#allocation11 + $0x30] sm:$0xff]   ;;  %v838_v38 = vld [vmem:[#allocation11 + $0x28] sm:$0xff]  }
  0x56   :  { %v839_v39 = vld [vmem:[#allocation11 + $0x20] sm:$0xff]   ;;  %v840_v40 = vld [vmem:[#allocation11 + $0x18] sm:$0xff]   ;;  %v653_v41 = vld [vmem:[%s1203_s5] ss:$0 sm:$0xff] }
  0x57   :  { %722 = vmatpush3.bf16.msra.mxu0 %v813_v3  ;;  %742 = vmatpush3.bf16.msra.mxu1 %v822_v8  ;;  %v841_v51 = vld [vmem:[#allocation11 + $0x10] sm:$0xff]   ;;  %v842_v52 = vld [vmem:[#allocation11 + $0x8] sm:$0xff]   ;;  %v843_v53 = vld [vmem:[#allocation11] sm:$0xff]  }
  0x58   :  { %723 = vmatprep.subr.bf16.mxu0 %v1026_v0  ;;  %743 = vmatprep.subr.bf16.mxu1 %v1026_v0  ;;  %v662_v54 = vld [vmem:[%s1205_s7] ss:$0 sm:$0xff]  ;;  %v591_v1 = vld [vmem:[#allocation5] sm:$0xff]  ;;  %s1028_s7 = smov [#allocation14]  }
  0x59   :  { %v671_v2 = vld [vmem:[%s1207_s9] ss:$0 sm:$0xff]  ;;  %s624_s22 = sshll.u32 %s1028_s7, 4  ;;  %s625_s22 = int_to_ptr.vmem [resolvable:$true] %s624_s22 }
  0x5a   :  { %s964_s9 = scalar_lea.vmem %s625_s22, 256  ;;  %p969_p3 = scmp.lt.s32.totalorder %s625_s22, %s625_s22 }
  0x5b   :  { %724 = vmatpush3.bf16.msra.mxu0 %v814_v5  ;;  %744 = vmatpush3.bf16.msra.mxu1 %v823_v10  ;;  %v592_v5 = vld [vmem:[#allocation5 + $0x8] sm:$0xff]  ;;  %p965_p2 = scmp.ne.s32.totalorder %s625_s22, %s964_s9  ;;  %p970_p4 = scmp.lt.s32.totalorder %s964_s9, %s964_s9 }
  0x5c   :  { %725 = vmatprep.subr.bf16.mxu0 %v1026_v0  ;;  %745 = vmatprep.subr.bf16.mxu1 %v1026_v0 }
  0x5d   :  { %p971_p5 = por %p970_p4, %p969_p3 }
  0x5f   :  { %726 = vmatpush3.bf16.msra.mxu0 %v815_v7  ;;  %746 = vmatpush3.bf16.msra.mxu1 %v824_v12  ;;  %p972_p6 = pnand %p971_p5, %p965_p2 }
  0x60   :  { %727 = vmatprep.subr.bf16.mxu0 %v1026_v0  ;;  %747 = vmatprep.subr.bf16.mxu1 %v1026_v0 }
  0x63   :  { %728 = vmatpush3.bf16.msra.mxu0 %v816_v9  ;;  %748 = vmatpush3.bf16.msra.mxu1 %v825_v15 }
  0x64   :  { %729 = vmatprep.subr.bf16.mxu0 %v1026_v0  ;;  %749 = vmatprep.subr.bf16.mxu1 %v1026_v0 }
  0x67   :  { %730 = vmatpush3.bf16.msra.mxu0 %v817_v11  ;;  %750 = vmatpush3.bf16.msra.mxu1 %v826_v16 }
  0x68   :  { %731 = vmatprep.subr.bf16.mxu0 %v1026_v0  ;;  %751 = vmatprep.subr.bf16.mxu1 %v1026_v0 }
  0x6b   :  { %732 = vmatpush3.bf16.msra.mxu0 %v818_v13  ;;  %752 = vmatpush3.bf16.msra.mxu1 %v827_v17 }
  0x6c   :  { %757 = vmatprep.subr.bf16.mxu0 %v1026_v0  ;;  %777 = vmatprep.subr.bf16.mxu1 %v1026_v0 }
  0x6e   :  { %734 = vmatmul.mubr.bf16.vlgmr.msra.gmra.mxu0 %v819_v14 }
  0x6f   :  { %773 = vmatprep.mubr.msk.bf16.mxu0 %vm1027_vm0, %v1026_v0  ;;  %758 = vmatpush3.bf16.msra.mxu0 %v828_v18 }
  0x70   :  { %759 = vmatprep.subr.bf16.mxu0 %v1026_v0 }
  0x73   :  { %760 = vmatpush3.bf16.msra.mxu0 %v829_v19 }
  0x74   :  { %761 = vmatprep.subr.bf16.mxu0 %v1026_v0 }
  0x77   :  { %762 = vmatpush3.bf16.msra.mxu0 %v830_v20 }
  0x78   :  { %763 = vmatprep.subr.bf16.mxu0 %v1026_v0 }
  0x7b   :  { %764 = vmatpush3.bf16.msra.mxu0 %v831_v21 }
  0x7c   :  { %765 = vmatprep.subr.bf16.mxu0 %v1026_v0 }
  0x7f   :  { %766 = vmatpush3.bf16.msra.mxu0 %v832_v22 }
  0x80   :  { %767 = vmatprep.subr.bf16.mxu0 %v1026_v0 }
  0x83   :  { %768 = vmatpush3.bf16.msra.mxu0 %v833_v33 }
  0x84   :  { %769 = vmatprep.subr.bf16.mxu0 %v1026_v0 }
  0x87   :  { %770 = vmatpush3.bf16.msra.mxu0 %v834_v34 }
  0x88   :  { %771 = vmatprep.subr.bf16.mxu0 %v1026_v0 }
  0x8b   :  { %772 = vmatpush3.bf16.msra.mxu0 %v835_v35 }
 0x12e   :  { %v238_v24 = vpop.f32.mrf.mxu0 }
 0x12f   :  { %v239_v26 = vadd.f32 %v643_v23, %v238_v24 }
 0x130   :  { %v735_v25 = vpop.f32.mrf.mxu0 }
 0x131   :  { %v245_v30 = vmax.f32 %v239_v26, 0.0 }
 0x132   :  { %v241_v27 = vpop.f32.mrf.mxu0 }
 0x133   :  { %v242_v28 = vadd.f32 %v643_v23, %v241_v27 }
 0x134   :  { %v736_v29 = vpop.f32.mrf.mxu0 }
 0x135   :  { %v246_v31 = vmax.f32 %v242_v28, 0.0 }
 0x137   :  { %v247_v32 = vpack.c.bf16 %v246_v31, %v245_v30 }
 0x139   :  { %754 = vmatmul.mubr.bf16.vlgmr.msra.gmra.mxu1 %v247_v32 }
 0x13a   :  { %793 = vmatprep.mubr.msk.bf16.mxu1 %vm1027_vm0, %v1026_v0  ;;  %778 = vmatpush3.bf16.msra.mxu1 %v836_v36 }
 0x13b   :  { %779 = vmatprep.subr.bf16.mxu1 %v1026_v0 }
 0x13e   :  { %780 = vmatpush3.bf16.msra.mxu1 %v837_v37 }
 0x13f   :  { %781 = vmatprep.subr.bf16.mxu1 %v1026_v0 }
 0x142   :  { %782 = vmatpush3.bf16.msra.mxu1 %v838_v38 }
 0x143   :  { %783 = vmatprep.subr.bf16.mxu1 %v1026_v0 }
 0x146   :  { %784 = vmatpush3.bf16.msra.mxu1 %v839_v39 }
 0x147   :  { %785 = vmatprep.subr.bf16.mxu1 %v1026_v0 }
 0x14a   :  { %786 = vmatpush3.bf16.msra.mxu1 %v840_v40 }
 0x14b   :  { %787 = vmatprep.subr.bf16.mxu1 %v1026_v0 }
 0x14e   :  { %788 = vmatpush3.bf16.msra.mxu1 %v841_v51 }
 0x14f   :  { %789 = vmatprep.subr.bf16.mxu1 %v1026_v0 }
 0x152   :  { %790 = vmatpush3.bf16.msra.mxu1 %v842_v52 }
 0x153   :  { %791 = vmatprep.subr.bf16.mxu1 %v1026_v0  ;;  %v680_v0 = vld [vmem:[%s1208_s10] ss:$0 sm:$0xff] }
 0x154   :  { %v599_v3 = vmul.f32 %v680_v0, %v591_v1  ;;  %v600_v9 = vmul.f32 %v680_v0, %v592_v5 }
 0x156   :  { %792 = vmatpush3.bf16.msra.mxu1 %v843_v53 }
 0x1f9   :  { %v353_v42 = vpop.f32.mrf.mxu1 }
 0x1fa   :  { %v354_v44 = vadd.f32 %v653_v41, %v353_v42 }
 0x1fb   :  { %v755_v43 = vpop.f32.mrf.mxu1 }
 0x1fc   :  { %v360_v48 = vmax.f32 %v354_v44, 0.0 }
 0x1fd   :  { %v356_v45 = vpop.f32.mrf.mxu1 }
 0x1fe   :  { %v357_v46 = vadd.f32 %v653_v41, %v356_v45 }
 0x1ff   :  { %v756_v47 = vpop.f32.mrf.mxu1 }
 0x200   :  { %v361_v49 = vmax.f32 %v357_v46, 0.0 }
 0x202   :  { %v362_v50 = vpack.c.bf16 %v361_v49, %v360_v48 }
 0x204   :  { %774 = vmatmul.mubr.bf16.vlgmr.msra.gmra.mxu0 %v362_v50 }
 0x2c4   :  { %v468_v55 = vpop.f32.mrf.mxu0 }
 0x2c5   :  { %v469_v57 = vadd.f32 %v662_v54, %v468_v55 }
 0x2c6   :  { %v775_v56 = vpop.f32.mrf.mxu0 }
 0x2c7   :  { %v475_v61 = vmax.f32 %v469_v57, 0.0 }
 0x2c8   :  { %v471_v58 = vpop.f32.mrf.mxu0 }
 0x2c9   :  { %v472_v59 = vadd.f32 %v662_v54, %v471_v58 }
 0x2ca   :  { %v776_v60 = vpop.f32.mrf.mxu0 }
 0x2cb   :  { %v476_v62 = vmax.f32 %v472_v59, 0.0 }
 0x2cd   :  { %v477_v63 = vpack.c.bf16 %v476_v62, %v475_v61 }
 0x2cf   :  { %794 = vmatmul.mubr.bf16.vlgmr.msra.gmra.mxu1 %v477_v63 }
 0x38f   :  { %v583_v4 = vpop.f32.mrf.mxu1 }
 0x390   :  { %v584_v6 = vadd.f32 %v671_v2, %v583_v4 }
 0x391   :  { %v795_v7 = vpop.f32.mrf.mxu1 }
 0x392   :  { %v601_v8 = vadd.f32 %v599_v3, %v584_v6  ;;  %605 = vst [vmem:[#allocation14] sm:$0xff] %v584_v6 }
 0x393   :  { %v586_v10 = vpop.f32.mrf.mxu1 }
 0x394   :  { %603 = vst [vmem:[#allocation13] sm:$0xff] %v601_v8  ;;  %v587_v11 = vadd.f32 %v671_v2, %v586_v10 }
 0x395   :  { %v796_v12 = vpop.f32.mrf.mxu1 }
 0x396   :  { %v602_v13 = vadd.f32 %v600_v9, %v587_v11  ;;  %606 = vst [vmem:[#allocation14 + $0x8] sm:$0xff] %v587_v11 }
 0x397   :  { %975 = shalt.err (!%p972_p6)
}
 0x398   :  { %630 = dma.vmem_to_hbm [thread:$0]  %s625_s22, 256, %s1210_s12, [#allocation15], %s1017_s24, %s1017_s24, %s1018_s25   ;;  %604 = vst [vmem:[#allocation13 + $0x8] sm:$0xff] %v602_v13 }
 0x399   :  { %s984_s27 = scalar_lea.vmem %s613_s4, 256  ;;  %p989_p8 = scmp.lt.s32.totalorder %s613_s4, %s613_s4 }
 0x39a   :  { %p985_p7 = scmp.ne.s32.totalorder %s613_s4, %s984_s27  ;;  %p990_p9 = scmp.lt.s32.totalorder %s984_s27, %s984_s27 }
 0x39c   :  { %p991_p10 = por %p990_p9, %p989_p8 }
 0x39e   :  { %p992_p11 = pnand %p991_p10, %p985_p7 }
 0x3a0   :  { %995 = shalt.err (!%p992_p11)
}
 0x3a1   :  { %618 = dma.vmem_to_hbm [thread:$0]  %s613_s4, 256, %s1209_s11, [#allocation4], %s1017_s24, %s1017_s24, %s1018_s25  }
 0x3a2   :  { %1012 = dma.done.wait [#allocation4], 256  }
 0x3a3   :  { %1013 = vsyncadd [#allocation4], 4294967040 }
 0x3a4   :  { %1014 = dma.done.wait [#allocation15], 256  }
 0x3a5   :  { %1015 = vsyncadd [#allocation15], 4294967040 }
 0x3a6   :  { %637 = vsyncpa [#allocation3], 1 }
 0x3a7   :  { %638 = vsyncpa [#allocation6], 1 }
 0x3a8   :  { %639 = vsyncpa [#allocation9], 1 }
 0x3a9   :  { %640 = vsyncpa [#allocation12], 1 }
 0x3aa   :  { %641 = vsyncpa [#allocation4], 1 }
 0x3ab   :  { %642 = vsyncpa [#allocation15], 1 }

</bundles_post_ra>
